<compile_context>
chip_gen: v5e
topology: v5e:2x2
jax: 0.10.0
libtpu: 0.0.40
codegen_flags: <defaults>
</compile_context>

<pallas_src>
from functools import partial

import jax
import jax.numpy as jnp
import numpy as np
from jax import lax
from jax.experimental import pallas as pl
from jax.experimental.pallas import tpu as pltpu


# ------------------------------ fused kernel -------------------------------- #

def _fused_transient_attention_kernel(
    x_ref, wqkv_ref, *rest, num_heads, scale, qkv_bias, mxu_dtype
):
    """One batch-group block of the fused forward.

    x_ref:     (G, N, C)  token-major activations for G batch elements
    wqkv_ref:  (C, 3C)    [bqkv_ref: (1, 3C) only when qkv_bias=True]
    wproj_ref: (C, C)     bproj_ref: (1, C)
    o_ref:     (G, N, C)
    """
    if qkv_bias:
        bqkv_ref, wproj_ref, bproj_ref, o_ref = rest
    else:
        bqkv_ref = None
        wproj_ref, bproj_ref, o_ref = rest

    G, N, C = x_ref.shape
    H = num_heads
    Dh = C // H

    # Flatten the batch group into one big GEMM M-dimension (G*N rows).
    xf = x_ref[...].reshape(G * N, C).astype(mxu_dtype)

    # ---- QKV projection: single (G*N, C) x (C, 3C) MXU matmul, f32 accumulation.
    qkv = jnp.dot(xf, wqkv_ref[...].astype(mxu_dtype),
                  preferred_element_type=jnp.float32)              # (G*N, 3C) f32
    if qkv_bias:
        qkv = qkv + bqkv_ref[...].astype(jnp.float32)

    # ---- causal mask (strict upper triangle -> -1e9), built once per block.
    row = lax.broadcasted_iota(jnp.int32, (G, N, N), 1)
    col = lax.broadcasted_iota(jnp.int32, (G, N, N), 2)
    keep = col <= row

    # ---- per-head attention; output projection accumulated per head (no concat).
    acc = jnp.zeros((G * N, C), jnp.float32)
    for h in range(H):                      # static unroll; H is compile-time const
        # scale folded into q (G*N*Dh multiplies instead of G*N*N)
        q = (qkv[:, h * Dh:(h + 1) * Dh] * scale).astype(mxu_dtype).reshape(G, N, Dh)
        k = qkv[:, C + h * Dh: C + (h + 1) * Dh].astype(mxu_dtype).reshape(G, N, Dh)
        v = qkv[:, 2 * C + h * Dh: 2 * C + (h + 1) * Dh].astype(mxu_dtype).reshape(G, N, Dh)

        s = jnp.einsum("gnd,gmd->gnm", q, k,
                       preferred_element_type=jnp.float32)         # (G, N, N) f32
        s = jnp.where(keep, s, jnp.float32(-1.0e9))

        # numerically-stable softmax; normalization deferred to after the PV matmul
        # so the reciprocal multiply touches G*N*Dh elements instead of G*N*N.
        m = jnp.max(s, axis=-1, keepdims=True)
        p = jnp.exp(s - m)
        l = jnp.sum(p, axis=-1, keepdims=True)

        # attn_drop is identity (p=0.0)
        o_h = jnp.einsum("gnm,gmd->gnd", p.astype(mxu_dtype), v,
                         preferred_element_type=jnp.float32)       # (G, N, Dh) f32
        o_h = o_h * pl.reciprocal(l, approx=True)                  # EUP slot (free)

        # this head's slice of the output projection (proj_drop is identity)
        acc = acc + jnp.dot(
            o_h.reshape(G * N, Dh).astype(mxu_dtype),
            wproj_ref[h * Dh:(h + 1) * Dh, :].astype(mxu_dtype),
            preferred_element_type=jnp.float32)                    # (G*N, C) f32

    out = acc + bproj_ref[...].astype(jnp.float32)
    # TODO(synk): when C < 128 this store is lane-masked (vst.msk); a lane-dense
    # (G, N*C) output packing would help most on v5e but needs a Mosaic relayout.
    o_ref[...] = out.reshape(G, N, C).astype(o_ref.dtype)


# ------------------------------ wrapper -------------------------------------- #

def _choose_batch_group(B, N, target_rows=512, min_steps=2):
    """Largest divisor G of B such that G*N rows feed the MXU well, preferring a
    256-aligned (v6e/v7x) then 128-aligned (v5e) M, while keeping >= min_steps grid
    steps so a 2-TensorCore v7x chip can shard batches across cores."""
    divisors = [g for g in range(1, B + 1) if B % g == 0]
    cands = [g for g in divisors if B // g >= min_steps] or divisors
    fitting = [g for g in cands if g * N <= target_rows]
    if not fitting:
        return min(cands)
    for align in (256, 128):
        aligned = [g for g in fitting if (g * N) % align == 0]
        if aligned:
            return max(aligned)
    return max(fitting)


def transient_attention_forward(x, params, num_heads=1, compute_dtype=None,
                                batch_group=None):
    """x: (B, C, N) (PyTorch input layout). Returns (B, N, C), like the module."""
    B, C, N = x.shape
    H = num_heads
    Dh = C // H
    scale = Dh ** (-0.5)
    qkv_bias = params.get("b_qkv", None) is not None
    mxu_dtype = jnp.dtype(compute_dtype) if compute_dtype is not None else x.dtype

    # Fold the module's (0, 2, 1) permute into the surrounding XLA graph so the
    # kernel sees token-major activations (no in-kernel transpose, C on lanes).
    x_t = jnp.transpose(x, (0, 2, 1))                               # (B, N, C)

    G = batch_group or _choose_batch_group(B, N)
    assert B % G == 0, "batch group must divide the batch"
    steps = B // G

    kernel = partial(_fused_transient_attention_kernel, num_heads=H, scale=scale,
                     qkv_bias=qkv_bias, mxu_dtype=mxu_dtype)

    in_specs = [pl.BlockSpec((G, N, C), lambda b: (b, 0, 0)),       # x (per group)
                pl.BlockSpec((C, 3 * C), lambda b: (0, 0))]         # w_qkv (resident)
    inputs = [x_t, params["w_qkv"]]
    if qkv_bias:
        in_specs.append(pl.BlockSpec((1, 3 * C), lambda b: (0, 0)))
        inputs.append(params["b_qkv"])
    in_specs += [pl.BlockSpec((C, C), lambda b: (0, 0)),            # w_proj (resident)
                 pl.BlockSpec((1, C), lambda b: (0, 0))]            # b_proj
    inputs += [params["w_proj"], params["b_proj"]]

    # Scoped-VMEM sizing from the live set, with 2x headroom; capped for v7x (64 MiB).
    isz = jnp.dtype(x.dtype).itemsize
    msz = jnp.dtype(mxu_dtype).itemsize
    est = (4 * G * N * C * isz                      # x + out blocks, double-buffered
           + 2 * (3 * C * C + C * C + 4 * C) * 4    # weights + biases
           + G * N * 3 * C * (4 + msz)              # qkv f32 + casted q/k/v
           + 2 * G * N * N * 4                      # scores + exp
           + G * N * (Dh + C) * 4)                  # per-head PV out + proj accumulator
    vmem_limit = int(min(max(2 * est, 32 * 2 ** 20), 64 * 2 ** 20))

    return pl.pallas_call(
        kernel,
        out_shape=jax.ShapeDtypeStruct((B, N, C), x.dtype),
        grid=(steps,),
        in_specs=in_specs,
        out_specs=pl.BlockSpec((G, N, C), lambda b: (b, 0, 0)),
        compiler_params=pltpu.CompilerParams(
            dimension_semantics=("parallel",),
            vmem_limit_bytes=vmem_limit),
    )(*inputs)


# ------------------------------ params -------------------------------------- #

def init_params(key, dim, num_heads=1, qkv_bias=False):
    k1, k2, k3 = jax.random.split(key, 3)
    # weights stored as (in, out) so the kernel does x @ W directly
    w_qkv = jax.random.normal(k1, (dim, 3 * dim), jnp.float32) * 0.02
    b_qkv = jnp.zeros((1, 3 * dim), jnp.float32) if qkv_bias else None
    w_proj = jax.random.normal(k2, (dim, dim), jnp.float32) * 0.02
    b_proj = jax.random.normal(k3, (1, dim), jnp.float32) * 0.02
    return dict(w_qkv=w_qkv, b_qkv=b_qkv, w_proj=w_proj, b_proj=b_proj)


# ------------------------------ reference (JAX) ------------------------------ #

def _reference(x, params, num_heads=1):
    B, C, N = x.shape
    H, Dh = num_heads, C // num_heads
    scale = Dh ** (-0.5)
    xt = jnp.transpose(x, (0, 2, 1))
    qkv = xt @ params["w_qkv"]
    if params.get("b_qkv", None) is not None:
        qkv = qkv + params["b_qkv"]
    qkv = qkv.reshape(B, N, 3, H, Dh).transpose(2, 0, 3, 1, 4)
    q, k, v = qkv[0], qkv[1], qkv[2]
    attn = jnp.einsum("bhnd,bhmd->bhnm", q, k) * scale
    mask = np.triu(np.ones((N, N)), k=1).astype(bool)
    attn = jnp.where(jnp.asarray(mask)[None, None], -1.0e9, attn)
    attn = jax.nn.softmax(attn, axis=-1)
    o = jnp.einsum("bhnm,bhmd->bhnd", attn, v).transpose(0, 2, 1, 3).reshape(B, N, C)
    return o @ params["w_proj"] + params["b_proj"]


# ---------------------------------- main ------------------------------------- #

if __name__ == "__main__":
    key = jax.random.PRNGKey(0)
    k_x, k_p = jax.random.split(key)

    B, dim, seq, num_heads = 2, 32, 8, 1
    x = jax.random.normal(k_x, (B, dim, seq), jnp.float32)   # (B, C, N)
    params = init_params(k_p, dim, num_heads=num_heads, qkv_bias=False)

    ref = _reference(x, params, num_heads=num_heads)

    # f32 MXU-operand path (matches reference up to the EUP approx reciprocal)
    out = transient_attention_forward(x, params, num_heads=num_heads)
    out = jax.block_until_ready(out)
    assert out.shape == (B, seq, dim)
    np.testing.assert_allclose(np.asarray(out), np.asarray(ref), rtol=2e-3, atol=2e-3)

    # bf16 MXU-operand path (f32 accumulation) -- the fast MXU path on v6e/v7x
    out_bf16 = transient_attention_forward(x, params, num_heads=num_heads,
                                           compute_dtype=jnp.bfloat16)
    out_bf16 = jax.block_until_ready(out_bf16)
    np.testing.assert_allclose(np.asarray(out_bf16), np.asarray(ref),
                               rtol=3e-2, atol=3e-2)

    print("KERNEL_OK")
</pallas_src>

<mosaic_0001>
module attributes {stable_mosaic.version = 11 : i64} {
  func.func @_fused_transient_attention_kernel(%arg0: i32, %arg1: memref<1x8x32xf32, #tpu.memory_space<vmem>>, %arg2: memref<32x96xf32, #tpu.memory_space<vmem>>, %arg3: memref<32x32xf32, #tpu.memory_space<vmem>>, %arg4: memref<1x32xf32, #tpu.memory_space<vmem>>, %arg5: memref<1x8x32xf32, #tpu.memory_space<vmem>>) attributes {dimension_semantics = [#tpu.dimension_semantics<parallel>], iteration_bounds = array<i64: 2>, scalar_prefetch = 0 : i64, scratch_operands = 0 : i64, tpu.core_type = #tpu.core_type<tc>, window_params = [{transform_indices = @transform_0, window_bounds = array<i64: 1, 8, 32>}, {pipeline_mode = #tpu.pipeline_mode<synchronous>, transform_indices = @transform_1, window_bounds = array<i64: 32, 96>}, {pipeline_mode = #tpu.pipeline_mode<synchronous>, transform_indices = @transform_2, window_bounds = array<i64: 32, 32>}, {pipeline_mode = #tpu.pipeline_mode<synchronous>, transform_indices = @transform_3, window_bounds = array<i64: 1, 32>}, {transform_indices = @transform_4, window_bounds = array<i64: 1, 8, 32>}]} {
    %c0 = arith.constant 0 : index
    %c0_0 = arith.constant 0 : index
    %c0_1 = arith.constant 0 : index
    %0 = vector.load %arg1[%c0, %c0_0, %c0_1] : memref<1x8x32xf32, #tpu.memory_space<vmem>>, vector<1x8x32xf32>
    %1 = vector.shape_cast %0 : vector<1x8x32xf32> to vector<8x32xf32>
    %c0_2 = arith.constant 0 : index
    %c0_3 = arith.constant 0 : index
    %2 = vector.load %arg2[%c0_2, %c0_3] : memref<32x96xf32, #tpu.memory_space<vmem>>, vector<32x96xf32>
    %cst = arith.constant dense<0.000000e+00> : vector<8x96xf32>
    %3 = tpu.matmul %1, %2, %cst {dimension_numbers = #tpu.dot_dimension_numbers<[1], [0], [0], [1], [0, 0, 1, 1], [], []>} : vector<8x32xf32>, vector<32x96xf32>, vector<8x96xf32> -> vector<8x96xf32>
    %4 = tpu.iota {dimensions = array<i32: 1>} : vector<1x8x8xi32>
    %5 = tpu.iota {dimensions = array<i32: 2>} : vector<1x8x8xi32>
    %6 = arith.cmpi sle, %5, %4 : vector<1x8x8xi32>
    %cst_4 = arith.constant 0.000000e+00 : f32
    %7 = vector.broadcast %cst_4 : f32 to vector<8x32xf32>
    %8 = vector.extract_strided_slice %3 {offsets = [0, 0], sizes = [8, 32], strides = [1, 1]} : vector<8x96xf32> to vector<8x32xf32>
    %cst_5 = arith.constant 0.176776692 : f32
    %9 = vector.broadcast %cst_5 : f32 to vector<8x32xf32>
    %10 = arith.mulf %8, %9 : vector<8x32xf32>
    %11 = vector.shape_cast %10 : vector<8x32xf32> to vector<1x8x32xf32>
    %12 = vector.extract_strided_slice %3 {offsets = [0, 32], sizes = [8, 32], strides = [1, 1]} : vector<8x96xf32> to vector<8x32xf32>
    %13 = vector.shape_cast %12 : vector<8x32xf32> to vector<1x8x32xf32>
    %14 = vector.extract_strided_slice %3 {offsets = [0, 64], sizes = [8, 32], strides = [1, 1]} : vector<8x96xf32> to vector<8x32xf32>
    %15 = vector.shape_cast %14 : vector<8x32xf32> to vector<1x8x32xf32>
    "tpu.trace_start"() <{level = 10 : i32, message = "gnd,gmd->gnm"}> : () -> ()
    %cst_6 = arith.constant dense<0.000000e+00> : vector<1x8x8xf32>
    %16 = tpu.matmul %11, %13, %cst_6 {dimension_numbers = #tpu.dot_dimension_numbers<[2], [2], [1], [1], [0, 0, 0, 1, 1, 1], [0], [0]>} : vector<1x8x32xf32>, vector<1x8x32xf32>, vector<1x8x8xf32> -> vector<1x8x8xf32>
    %cst_7 = arith.constant -1.000000e+09 : f32
    "tpu.trace_stop"() : () -> ()
    %17 = vector.broadcast %cst_7 : f32 to vector<1x8x8xf32>
    %18 = arith.select %6, %16, %17 : vector<1x8x8xi1>, vector<1x8x8xf32>
    %cst_8 = arith.constant dense<0xFF800000> : vector<1x8xf32>
    %19 = vector.multi_reduction <maximumf>, %18, %cst_8 [2] : vector<1x8x8xf32> to vector<1x8xf32>
    %20 = vector.shape_cast %19 : vector<1x8xf32> to vector<1x8x1xf32>
    %21 = vector.broadcast %20 : vector<1x8x1xf32> to vector<1x8x8xf32>
    %22 = arith.subf %18, %21 : vector<1x8x8xf32>
    %23 = math.exp %22 : vector<1x8x8xf32>
    %cst_9 = arith.constant dense<0.000000e+00> : vector<1x8xf32>
    %24 = vector.multi_reduction <add>, %23, %cst_9 [2] : vector<1x8x8xf32> to vector<1x8xf32>
    %25 = vector.shape_cast %24 : vector<1x8xf32> to vector<1x8x1xf32>
    "tpu.trace_start"() <{level = 10 : i32, message = "gnm,gmd->gnd"}> : () -> ()
    %cst_10 = arith.constant dense<0.000000e+00> : vector<1x8x32xf32>
    %26 = tpu.matmul %23, %15, %cst_10 {dimension_numbers = #tpu.dot_dimension_numbers<[2], [1], [1], [2], [0, 0, 0, 1, 1, 2], [0], [0]>} : vector<1x8x8xf32>, vector<1x8x32xf32>, vector<1x8x32xf32> -> vector<1x8x32xf32>
    "tpu.trace_stop"() : () -> ()
    %27 = tpu.reciprocal %25 {approx = true} : vector<1x8x1xf32> -> vector<1x8x1xf32>
    %28 = vector.broadcast %27 : vector<1x8x1xf32> to vector<1x8x32xf32>
    %29 = arith.mulf %26, %28 : vector<1x8x32xf32>
    %30 = vector.shape_cast %29 : vector<1x8x32xf32> to vector<8x32xf32>
    %c0_11 = arith.constant 0 : index
    %c0_12 = arith.constant 0 : index
    %31 = vector.load %arg3[%c0_11, %c0_12] : memref<32x32xf32, #tpu.memory_space<vmem>>, vector<32x32xf32>
    %cst_13 = arith.constant dense<0.000000e+00> : vector<8x32xf32>
    %32 = tpu.matmul %30, %31, %cst_13 {dimension_numbers = #tpu.dot_dimension_numbers<[1], [0], [0], [1], [0, 0, 1, 1], [], []>} : vector<8x32xf32>, vector<32x32xf32>, vector<8x32xf32> -> vector<8x32xf32>
    %33 = arith.addf %7, %32 : vector<8x32xf32>
    %c0_14 = arith.constant 0 : index
    %c0_15 = arith.constant 0 : index
    %34 = vector.load %arg4[%c0_14, %c0_15] : memref<1x32xf32, #tpu.memory_space<vmem>>, vector<1x32xf32>
    %35 = vector.broadcast %34 : vector<1x32xf32> to vector<8x32xf32>
    %36 = arith.addf %33, %35 : vector<8x32xf32>
    %37 = vector.shape_cast %36 : vector<8x32xf32> to vector<1x8x32xf32>
    %c0_16 = arith.constant 0 : index
    %c0_17 = arith.constant 0 : index
    %c0_18 = arith.constant 0 : index
    %38 = vector.load %arg5[%c0_16, %c0_17, %c0_18] : memref<1x8x32xf32, #tpu.memory_space<vmem>>, vector<1x8x32xf32>
    tpu.vector_store %arg5[%c0_16, %c0_17, %c0_18], %37 {strides = array<i32>} : memref<1x8x32xf32, #tpu.memory_space<vmem>>, vector<1x8x32xf32>,
    return
  }
  func.func @transform_0(%arg0: i32) -> (i32, i32, i32) {
    %c0_i32 = arith.constant 0 : i32
    %c0_i32_0 = arith.constant 0 : i32
    %c0_i32_1 = arith.constant 0 : i32
    return %arg0, %c0_i32, %c0_i32_0 : i32, i32, i32
  }
  func.func @transform_1(%arg0: i32) -> (i32, i32) {
    %c0_i32 = arith.constant 0 : i32
    %c0_i32_0 = arith.constant 0 : i32
    %c0_i32_1 = arith.constant 0 : i32
    return %c0_i32, %c0_i32_0 : i32, i32
  }
  func.func @transform_2(%arg0: i32) -> (i32, i32) {
    %c0_i32 = arith.constant 0 : i32
    %c0_i32_0 = arith.constant 0 : i32
    %c0_i32_1 = arith.constant 0 : i32
    return %c0_i32, %c0_i32_0 : i32, i32
  }
  func.func @transform_3(%arg0: i32) -> (i32, i32) {
    %c0_i32 = arith.constant 0 : i32
    %c0_i32_0 = arith.constant 0 : i32
    %c0_i32_1 = arith.constant 0 : i32
    return %c0_i32, %c0_i32_0 : i32, i32
  }
  func.func @transform_4(%arg0: i32) -> (i32, i32, i32) {
    %c0_i32 = arith.constant 0 : i32
    %c0_i32_0 = arith.constant 0 : i32
    %c0_i32_1 = arith.constant 0 : i32
    return %arg0, %c0_i32, %c0_i32_0 : i32, i32, i32
  }
}

</mosaic_0001>

<bundles_post_ra>
// kernel: tpu_custom_call.1
= control target key start
LH: loop header
LB: loop body
LE: loop exit
PB: predicated region body
PF: predicated region fallthrough
CT: control target
= control target key end

     0   :  { %9 = vsyncpa [#allocation3], 0  ;;  %s934_s0 = inlined_call_operand.hbm [shape: f32[2,8,32], index: 0, kind: input, shape index: {}]   ;;  %s935_s1 = inlined_call_operand.hbm [shape: f32[32,96], index: 1, kind: input, shape index: {}]   ;;  %s936_s2 = inlined_call_operand.hbm [shape: f32[32,32], index: 2, kind: input, shape index: {}]   ;;  %s937_s3 = inlined_call_operand.vmem [shape: f32[1,32], index: 3, kind: input, shape index: {}]   ;;  %s938_s4 = inlined_call_operand.hbm [shape: f32[2,8,32], index: 4, kind: output, shape index: {}]  }
   0x1   :  { %11 = vsyncpa [#allocation3 + $0x1], 0 }
   0x2   :  { %12 = vsyncpa [#allocation6], 0 }
   0x3   :  { %13 = vsyncpa [#allocation4], 0 }
   0x4   :  { %15 = vsyncpa [#allocation4 + $0x1], 0  ;;  %s777_s15 = smov 0   ;;  %s779_s16 = smov 0  }
   0x5   :  { %s781_s17 = smov 0   ;;  %s783_s18 = smov 0  }
   0x6 LB: > { %s152_s21 = sshll.u32 %s935_s1, 4  ;;  %s801_s22 = sadd.s32 4294967295, %s744_s18   ;;  %s744_s18 = sphi %s783_s18, %s949_s18   ;;  %s740_s17 = sphi %s781_s17, %s948_s17   ;;  %s736_s16 = sphi %s779_s16, %s947_s16   ;;  %s732_s15 = sphi %s777_s15, %s946_s15   ;;  %s153_s21 = int_to_ptr.hbm [resolvable:$true] %s152_s21 }
   0x7   : > { %p488_p0 = scmp.ge.s32.totalorder %s744_s18, 1  ;;  %p42_p1 = scmp.eq.s32.totalorder %s801_s22, 0 }
   0x8   : > { %p141_p2 = scmp.lt.s32.totalorder %s744_s18, 3  ;;  %s746_s24 = smov [#allocation5]  }
   0x9   : > { %s154_s25 = sshll.u32 %s746_s24, 4  ;;  %s166_s28 = sshll.u32 %s936_s2, 4  ;;  %s155_s25 = int_to_ptr.vmem [resolvable:$true] %s154_s25  ;;  %s167_s28 = int_to_ptr.hbm [resolvable:$true] %s166_s28 }
   0xa   : > { %p806_p3 = pnand %p488_p0, %p141_p2  ;;  %s747_s29 = smov [#allocation7]  }
   0xb   : > { %s168_s30 = sshll.u32 %s747_s29, 4  ;;  %s748_s5 = smov 128   ;;  %s169_s30 = int_to_ptr.vmem [resolvable:$true] %s168_s30 }
   0xc   : > { %p520_p4 = pneg %p806_p3  ;;  %s749_s6 = smov 8  }
   0xd   : > { %s487_s7 = sadd.s32 4294967294, %s744_s18   ;;  %s820_s8 = sadd.s32 1, %s744_s18  }
   0xe   : > { %p521_p6 = pnand %p520_p4, %p42_p1  ;;  %s25_s9 = ssub.s32 %s744_s18, %s820_s8 }
   0xf   : > { %s28_s10 = sadd.s32 1, %s740_s17  ;;  %p26_p7 = scmp.eq.s32.totalorder %s25_s9, 0 }
  0x10   : > { %523 = dma.hbm_to_vmem [thread:$0]  (!%p521_p6), %s153_s21, 512, %s155_s25, [#allocation6], %s748_s5, %s748_s5, %s749_s6  }
  0x11   : > { %526 = dma.hbm_to_vmem [thread:$0]  (!%p521_p6), %s167_s28, 512, %s169_s30, [#allocation6], %s748_s5, %s748_s5, %s749_s6  }
  0x12   : > { %p35_p8 = scmp.ne.s32.totalorder %s740_s17, %s736_s16  ;;  %p36_p9 = scmp.eq.s32.totalorder %s744_s18, 0 }
  0x13   : > { %p41_p10 = scmp.ne.s32.totalorder %s736_s16, %s732_s15  ;;  %p128_p13 = scmp.eq.s32.totalorder %s801_s22, 1 }
  0x14   : > { %s831_s11 = scalar_select %p26_p7, %s740_s17, %s28_s10  }
  0x15   : > { %p833_p11 = por %p36_p9, %p35_p8  ;;  %p839_p12 = por %p42_p1, %p41_p10 }
  0x16   : > { %p134_p0 = scmp.eq.s32.totalorder %s487_s7, 1  ;;  %p537_p2 = scmp.lt.s32.totalorder %s744_s18, 2 }
  0x17   : > { %s185_s14 = sand.u32 1, %s740_s17   ;;  %p846_p4 = por %p128_p13, %p35_p8 }
  0x18   : > { %p850_p6 = por %p134_p0, %p41_p10  ;;  %s492_s21 = sshll.u32 %s185_s14, 3 }
  0x19   : > { %s493_s24 = sshll.u32 %s744_s18, 3  ;;  %s189_s28 = scalar_lea.vmem [#allocation2], %s492_s21 }
  0x1a   : > { %s193_s27 = scalar_lea.hbm %s934_s0, %s493_s24  ;;  %s197_s29 = sshll.u32 %s189_s28, 4  ;;  %s198_s29 = int_to_ptr.vmem [resolvable:$true] %s197_s29 }
  0x1b   : > { %s195_s30 = sshll.u32 %s193_s27, 4  ;;  %p860_p7 = pnand %p537_p2, %p833_p11  ;;  %s196_s30 = int_to_ptr.hbm [resolvable:$true] %s195_s30 }
  0x1c   : > { %s186_s6 = scalar_lea.sflag [#allocation3], %s185_s14  ;;  %s644_s7 = sshra.s32 %s196_s30, 4  ;;  %s645_s7 = int_to_ptr.hbm [resolvable:$true] %s644_s7 }
  0x1d   : > { %s646_s9 = scalar_lea.hbm %s645_s7, 8  ;;  %p648_p9 = pneg %p860_p7 }
  0x1e   : > { %p647_p8 = scmp.ne.s32.totalorder %s645_s7, %s646_s9  ;;  %s651_s24 = scalar_lea.hbm %s934_s0, 16 }
  0x1f   : > { %p652_p11 = scmp.lt.s32.totalorder %s645_s7, %s934_s0  ;;  %p653_p0 = scmp.lt.s32.totalorder %s651_s24, %s646_s9 }
  0x20   : > { %p649_p10 = pnand %p648_p9, %p647_p8 }
  0x21   : > { %p654_p2 = por %p653_p0, %p652_p11 }
  0x22   : > { %p650_p13 = pneg %p649_p10 }
  0x24   : > { %p655_p5 = pnand %p654_p2, %p650_p13 }
  0x26   : > { %658 = shalt.err (!%p655_p5)
}
  0x27   : > { %530 = dma.hbm_to_vmem [thread:$0]  (!%p860_p7), %s196_s30, 128, %s198_s29, %s186_s6  }
  0x28   : > { %206 = sbr.rel (%p806_p3) target bundleno = 826 (0x33a), region = 36  ;;  %s877_s14 = sand.u32 (!%p806_p3), 1, %s736_s16  }
  0x29   : > { %s495_s26 = sshll.u32 (!%p806_p3), %s877_s14, 3  ;;  %s209_s27 = scalar_lea.sflag (!%p806_p3), [#allocation3], %s877_s14 }
  0x2a   : > { %s212_s28 = scalar_lea.vmem (!%p806_p3), [#allocation2], %s495_s26 }
  0x2d   : > { %719 = dma.done.wait (%p839_p12), %s209_s27, 128  }
  0x2e   : > { %721 = vsyncadd (%p839_p12), %s209_s27, 4294967168 }
  0x2f   : > { %723 = dma.done.wait (%p42_p1), [#allocation6], 1024  }
  0x30   : > { %725 = vsyncadd (%p42_p1), [#allocation6], 4294966272  ;;  %v252_v0 = vld [vmem:[#allocation5 + $0x18] sm:$0xff]  ;;  %v251_v1 = vld [vmem:[#allocation5 + $0x10] sm:$0xff]  ;;  %vm253_vm0 = vcmask 261120   ;;  %s750_s23 = smov 64   ;;  %v277_v9 = vlaneseq }
  0x31   : > { %269 = vmatpush.msra.mxu0 %v252_v0  ;;  %v250_v2 = vld [vmem:[#allocation5 + $0x8] sm:$0xff]  ;;  %v249_v3 = vld [vmem:[#allocation5] sm:$0xff]  ;;  %v248_v4 = vld [vmem:[%s212_s28] sm:$0xff]  ;;  %s751_s13 = smov 96   ;;  %vm312_vm2 = vcmask 64512   ;;  %s505_s29 = sshll.u32 %s801_s22, 3 }
  0x32   : > { %v278_v10 = vshrl.u32 %v277_v9, 7  ;;  %v280_v11 = vand.u32 127, %v277_v9  ;;  %v353_v20 = vld [vmem:[#allocation7 + $0x18] sm:$0xff]  ;;  %v352_v21 = vld [vmem:[#allocation7 + $0x10] sm:$0xff]  ;;  %v351_v22 = vld [vmem:[#allocation7 + $0x8] sm:$0xff]  ;;  %s393_s6 = scalar_lea.hbm %s938_s4, %s505_s29  ;;  %s247_s10 = scalar_lea.vmem [#allocation8], %s495_s26 }
  0x33   : > { %270 = vmatpush.msra.mxu0 %v251_v1  ;;  %373 = vmatpush.msra.mxu3 %v353_v20  ;;  %v350_v23 = vld [vmem:[#allocation7] sm:$0xff]  ;;  %v579_v28 = vld [vmem:[%s937_s3] ss:$0 sm:$0xff]  ;;  %s395_s21 = sshll.u32 %s247_s10, 4  ;;  %s397_s24 = sshll.u32 %s393_s6, 4  ;;  %s396_s21 = int_to_ptr.vmem [resolvable:$true] %s395_s21  ;;  %s398_s24 = int_to_ptr.hbm [resolvable:$true] %s397_s24 }
  0x34   : > { %vm281_vm1 = vcmp.le.s32.totalorder %v280_v11, %v278_v10  ;;  %s383_s22 = scalar_lea.sflag [#allocation4], %s877_s14  ;;  %s688_s25 = sshra.s32 %s398_s24, 4  ;;  %s689_s25 = int_to_ptr.hbm [resolvable:$true] %s688_s25 }
  0x35   : > { %271 = vmatpush.msra.mxu0 %v250_v2  ;;  %374 = vmatpush.msra.mxu3 %v352_v21  ;;  %s690_s12 = scalar_lea.hbm %s689_s25, 8  ;;  %s694_s26 = scalar_lea.hbm %s938_s4, 16 }
  0x36   : > { %p691_p1 = scmp.ne.s32.totalorder %s689_s25, %s690_s12  ;;  %p695_p12 = scmp.lt.s32.totalorder %s689_s25, %s938_s4 }
  0x37   : > { %272 = vmatpush.msra.mxu0 %v249_v3  ;;  %375 = vmatpush.msra.mxu3 %v351_v22  ;;  %p696_p7 = scmp.lt.s32.totalorder %s694_s26, %s690_s12 }
  0x38   : > { %499 = vmatmul.msk.f32.vlgmr.msra.gmra.mxu0 %vm253_vm0, %v248_v4  ;;  %p692_p3 = pnand %p691_p1, %p846_p4 }
  0x39   : > { %376 = vmatpush.msra.mxu3 %v350_v23  ;;  %p697_p8 = por %p696_p7, %p695_p12 }
  0x3a   : > { %p693_p5 = pneg %p692_p3 }
  0x3c   : > { %p698_p9 = pnand %p697_p8, %p693_p5 }
  0xb5   : > { %v274_v5 = vpop.f32.mrf.mxu0 }
  0xb6   : > { %322 = vrot.lane.b32.xlu1 %v274_v5, %s750_s23  ;;  %284 = vrot.lane.b32.xlu0 %v274_v5, %s751_s13  ;;  %v282_v8 = vmul.f32 0.17677669, %v274_v5 }
 0x128   : > { %v323_v6 = vpop.permute.xlu1 %322  ;;  %v285_v7 = vpop.permute.xlu0 %284 }
 0x129   : > { %500 = vmatpush.xpose.msk.msra.mxu1 %vm253_vm0, %v285_v7  ;;  %343 = vmatpush.msra.mxu2 %v323_v6 }
 0x12c   : > { %501 = vmatmul.msk.f32.vlgmr.msra.gmra.mxu1 %vm253_vm0, %v282_v8 }
 0x1a9   : > { %v308_v12 = vpop.f32.mrf.mxu1 }
 0x1aa   : > { %v311_v13 = vsel %vm281_vm1, %v308_v12, -1e+09 }
 0x1ab   : > { %v313_v14 = vsel %vm312_vm2, %v311_v13, -inf }
 0x1ac   : > { %314 = vmax.xlane.f32.xlu0 %v313_v14 }
 0x21f   : > { %v315_v15 = vpop.xlane.xlu0 %314 }
 0x220   : > { %v316_v16 = vsub.f32 %v311_v13, %v315_v15 }
 0x222   : > { %v317_v17 = vmul.f32 1.442695, %v316_v16 }
 0x224   : > { %580 = vpow2.f32 %v317_v17 }
 0x22a   : > { %v581_v18 = vpop.eup %580 }
 0x22b   : > { %502 = vmatmul.msk.f32.vlgmr.msra.gmra.mxu2 %vm312_vm2, %v581_v18  ;;  %v319_v19 = vsel %vm312_vm2, %v581_v18, 0.0 }
 0x22c   : > { %320 = vadd.xlane.f32.xlu1 %v319_v19 }
 0x29f   : > { %v321_v24 = vpop.xlane.xlu1 %320 }
 0x2a0   : > { %582 = vrcp.f32 %v321_v24 }
 0x2a6   : > { %v583_v25 = vpop.eup %582 }
 0x2ae   : > { %v345_v26 = vpop.f32.mrf.mxu2 }
 0x2af   : > { %v349_v27 = vmul.f32 %v583_v25, %v345_v26 }
 0x2b1   : > { %503 = vmatmul.msk.f32.vlgmr.msra.gmra.mxu3 %vm253_vm0, %v349_v27 }
 0x334   : > { %v378_v29 = vpop.f32.mrf.mxu3 }
 0x335   : > { %v379_v30 = vadd.f32 %v579_v28, %v378_v29 }
 0x337   : > { %381 = vst.msk [vmem:[%s247_s10] sm:$0xff] %vm253_vm0, %v379_v30 }
 0x338   : > { %701 = shalt.err (!%p698_p9)
}
 0x339   : > { %518 = dma.vmem_to_hbm [thread:$0]  (%p846_p4), %s396_s21, 128, %s398_s24, %s383_s22  }
 0x33a PF: > { %s409_s14 = sand.u32 1, %s732_s15   ;;  %p945_p10 = scmp.ge.s32.totalorder %s744_s18, 2 }
 0x33b   : > { %s410_s29 = scalar_lea.sflag [#allocation4], %s409_s14 }
 0x33c   : > { %p532_p13 = pnand %p945_p10, %p850_p6 }
 0x33e   : > { %p533_p11 = pneg %p532_p13 }
 0x340   : > { %727 = dma.done.wait (%p533_p11), %s410_s29, 128  }
 0x341   : > { %729 = vsyncadd (%p533_p11), %s410_s29, 4294967168  ;;  %p18_p0 = scmp.ge.s32.totalorder %s820_s8, 4   ;;  %s946_s15 = smov %s736_s16 }
 0x342   : > { %s947_s16 = smov %s740_s17  ;;  %s948_s17 = smov %s831_s11 }
 0x343   : > { %s949_s18 = smov %s820_s8  ;;  %20 = sbr.rel (!%p18_p0) target bundleno = 6 (0x6), region = 89 }
 0x348   :  { %416 = vsyncpa [#allocation3], 1 }
 0x349   :  { %418 = vsyncpa [#allocation3 + $0x1], 1 }
 0x34a   :  { %419 = vsyncpa [#allocation6], 1 }
 0x34b   :  { %420 = vsyncpa [#allocation4], 1 }
 0x34c   :  { %422 = vsyncpa [#allocation4 + $0x1], 1 }

</bundles_post_ra>
